<compile_context>
chip_gen: v5e
topology: v5e:2x2
jax: 0.10.0
libtpu: 0.0.40
codegen_flags: <defaults>
</compile_context>

<pallas_src>
import functools

import jax
import jax.numpy as jnp
from jax.experimental import pallas as pl
from jax.experimental.pallas import tpu as pltpu


def attention_net_kernel(x_ref, w_ref, b_ref, out_ref, *, input_dim):
    # Full input tile: (B_TILE, input_dim + M). Cast in-kernel (no HBM f32 copy,
    # and bf16 inputs arrive half-sized over HBM).
    xf = x_ref[...].astype(jnp.float32)

    # Fused attention_layer+hidden: logits = x_orig @ (w_att @ w_hid) + b_fused.
    # w_ref is zero-padded over the model_outputs columns, so the full tile is the LHS.
    logits = jnp.dot(xf, w_ref[...], preferred_element_type=jnp.float32) + b_ref[...]

    # Numerically-stable softmax statistics over the feature axis (dim=1).
    m = jnp.max(logits, axis=1, keepdims=True)
    e = jnp.exp(logits - m)                                   # (B_TILE, M)
    denom = jnp.sum(e, axis=1, keepdims=True)                 # (B_TILE, 1)

    # model_outputs is a static vreg slice of the already-loaded tile.
    mo = xf[:, input_dim:]                                    # (B_TILE, M)

    # sum(mo * softmax(logits)) = sum(mo * e) * (1/denom); no full attn temporary.
    num = jnp.sum(mo * e, axis=1, keepdims=True)              # (B_TILE, 1)
    out_ref[...] = num * pl.reciprocal(denom, approx=False)


def _round_up(n, m):
    return ((n + m - 1) // m) * m


def _pick_batch_tile(batch):
    """VMEM-budget-driven batch tile that guarantees >= 2 grid steps when possible.

    At 4096 rows the x block (48 cols, lane-padded to 128) is ~2 MiB f32 and the
    (B_TILE, 1) output block another ~2 MiB; double-buffered this is well inside the
    32 MiB scoped VMEM limit on all of v5e/v6e/v7x.
    """
    for t in (4096, 2048, 1024, 512, 256, 128):
        if batch >= 2 * t:      # largest tile that still yields >= 2 grid steps
            return t
    if batch > 128:
        return 128              # cdiv(batch, 128) >= 2 -> both v7x TCs get work
    # Tiny batch: a single block (rounded to the 8-row sublane granule).
    return max(8, _round_up(batch, 8))


def attention_net_forward(x, w_att, b_att, w_hid, b_hid, model_output_dim):
    """x: (B, input_dim + model_output_dim), any float dtype. Returns (B,) float32."""
    B, total_dim = x.shape
    input_dim = total_dim - model_output_dim
    M = model_output_dim

    # --- Algebraic fusion of the two Linear layers (no nonlinearity between them).
    w_att32 = w_att.astype(jnp.float32)
    w_hid32 = w_hid.astype(jnp.float32)
    w_fused = w_att32 @ w_hid32                                    # (input_dim, M)
    b_fused = (b_att.astype(jnp.float32) @ w_hid32
               + b_hid.astype(jnp.float32)).reshape(1, M)          # (1, M)
    # Zero-pad so the kernel can multiply the FULL x tile (no wrapper slices).
    w_padded = jnp.concatenate(
        [w_fused, jnp.zeros((M, M), dtype=jnp.float32)], axis=0)   # (total_dim, M)

    # --- Ceil-div batch tiling with explicit zero-padded tail.
    B_TILE = _pick_batch_tile(B)
    num_tiles = pl.cdiv(B, B_TILE)
    B_padded = num_tiles * B_TILE
    if B_padded != B:
        # Zero rows are numerically safe (logits = bias, denom > 0) and sliced off below.
        x = jnp.pad(x, ((0, B_padded - B), (0, 0)))

    dtype_bytes = jnp.dtype(x.dtype).itemsize
    cost = pl.CostEstimate(
        flops=2 * B_padded * total_dim * M,
        transcendentals=B_padded * M,
        bytes_accessed=(B_padded * total_dim * dtype_bytes
                        + total_dim * M * 4 + M * 4 + B_padded * 4),
    )

    kernel = functools.partial(attention_net_kernel, input_dim=input_dim)

    out = pl.pallas_call(
        kernel,
        out_shape=jax.ShapeDtypeStruct((B_padded, 1), jnp.float32),
        grid=(num_tiles,),
        in_specs=[
            pl.BlockSpec((B_TILE, total_dim), lambda i: (i, 0)),   # x tile (pipelined)
            pl.BlockSpec((total_dim, M), lambda i: (0, 0)),        # fused weight (resident)
            pl.BlockSpec((1, M), lambda i: (0, 0)),                # fused bias (resident)
        ],
        out_specs=pl.BlockSpec((B_TILE, 1), lambda i: (i, 0)),
        compiler_params=pltpu.CompilerParams(
            dimension_semantics=("parallel",),        # shards batch over v7x's 2 TCs
            vmem_limit_bytes=32 * 1024 * 1024,        # safe even on v7x's 64 MiB VMEM
        ),
        cost_estimate=cost,
    )(x, w_padded, b_fused)

    return out.reshape(B_padded)[:B]


def reference_forward(x, w_att, b_att, w_hid, b_hid, model_output_dim):
    """Pure-JAX reference mirroring the PyTorch forward (unfused)."""
    x = x.astype(jnp.float32)
    input_dim = x.shape[1] - model_output_dim
    x_orig, mo = x[:, :input_dim], x[:, input_dim:]
    h1 = x_orig @ w_att + b_att
    logits = h1 @ w_hid + b_hid
    attn = jax.nn.softmax(logits, axis=1)
    return jnp.sum(mo * attn, axis=1)


if __name__ == "__main__":
    # Small shapes consistent with the module (hidden_dim must equal input_dim).
    B = 256
    input_dim = 32
    hidden_dim = 32          # == input_dim, required by the PyTorch forward
    model_output_dim = 16
    # output_dim = 4         # output_layer is unused in forward

    key = jax.random.PRNGKey(0)
    kx, k1, k2, k3, k4 = jax.random.split(key, 5)

    x = jax.random.normal(kx, (B, input_dim + model_output_dim), dtype=jnp.float32)

    # Linear weights stored pre-transposed: (in_features, out_features).
    w_att = 0.1 * jax.random.normal(k1, (input_dim, hidden_dim), dtype=jnp.float32)
    b_att = 0.1 * jax.random.normal(k2, (hidden_dim,), dtype=jnp.float32)
    w_hid = 0.1 * jax.random.normal(k3, (hidden_dim, model_output_dim), dtype=jnp.float32)
    b_hid = 0.1 * jax.random.normal(k4, (model_output_dim,), dtype=jnp.float32)

    # 1) Divisible batch (grid of 2 tiles -> exercises the multi-step / 2-TC path).
    out = attention_net_forward(x, w_att, b_att, w_hid, b_hid, model_output_dim)
    out = jax.block_until_ready(out)
    ref = reference_forward(x, w_att, b_att, w_hid, b_hid, model_output_dim)
    assert out.shape == (B,)
    assert jnp.allclose(out, ref, atol=1e-5, rtol=1e-4), (out, ref)

    # 2) Non-divisible batch -> exercises the zero-padded tail path.
    B2 = 200
    out2 = attention_net_forward(x[:B2], w_att, b_att, w_hid, b_hid, model_output_dim)
    out2 = jax.block_until_ready(out2)
    ref2 = reference_forward(x[:B2], w_att, b_att, w_hid, b_hid, model_output_dim)
    assert out2.shape == (B2,)
    assert jnp.allclose(out2, ref2, atol=1e-5, rtol=1e-4), (out2, ref2)

    # 3) bf16 input accepted as-is (kernel upcasts in-VMEM); looser tolerance.
    out3 = attention_net_forward(x.astype(jnp.bfloat16), w_att, b_att, w_hid, b_hid,
                                 model_output_dim)
    out3 = jax.block_until_ready(out3)
    ref3 = reference_forward(x.astype(jnp.bfloat16), w_att, b_att, w_hid, b_hid,
                             model_output_dim)
    assert jnp.allclose(out3, ref3, atol=1e-2, rtol=1e-2), (out3, ref3)

    print("KERNEL_OK")
</pallas_src>

<mosaic_0001>
module attributes {stable_mosaic.version = 11 : i64} {
  func.func @attention_net_kernel(%arg0: i32, %arg1: memref<128x48xf32, #tpu.memory_space<vmem>>, %arg2: memref<48x16xf32, #tpu.memory_space<vmem>>, %arg3: memref<1x16xf32, #tpu.memory_space<vmem>>, %arg4: memref<128x1xf32, #tpu.memory_space<vmem>>) attributes {dimension_semantics = [#tpu.dimension_semantics<parallel>], iteration_bounds = array<i64: 2>, scalar_prefetch = 0 : i64, scratch_operands = 0 : i64, tpu.core_type = #tpu.core_type<tc>, window_params = [{transform_indices = @transform_0, window_bounds = array<i64: 128, 48>}, {pipeline_mode = #tpu.pipeline_mode<synchronous>, transform_indices = @transform_1, window_bounds = array<i64: 48, 16>}, {pipeline_mode = #tpu.pipeline_mode<synchronous>, transform_indices = @transform_2, window_bounds = array<i64: 1, 16>}, {transform_indices = @transform_3, window_bounds = array<i64: 128, 1>}]} {
    %c0 = arith.constant 0 : index
    %c0_0 = arith.constant 0 : index
    %0 = vector.load %arg1[%c0, %c0_0] : memref<128x48xf32, #tpu.memory_space<vmem>>, vector<128x48xf32>
    %c0_1 = arith.constant 0 : index
    %c0_2 = arith.constant 0 : index
    %1 = vector.load %arg2[%c0_1, %c0_2] : memref<48x16xf32, #tpu.memory_space<vmem>>, vector<48x16xf32>
    %cst = arith.constant dense<0.000000e+00> : vector<128x16xf32>
    %2 = tpu.matmul %0, %1, %cst {dimension_numbers = #tpu.dot_dimension_numbers<[1], [0], [0], [1], [0, 0, 1, 1], [], []>} : vector<128x48xf32>, vector<48x16xf32>, vector<128x16xf32> -> vector<128x16xf32>
    %c0_3 = arith.constant 0 : index
    %c0_4 = arith.constant 0 : index
    %3 = vector.load %arg3[%c0_3, %c0_4] : memref<1x16xf32, #tpu.memory_space<vmem>>, vector<1x16xf32>
    %4 = vector.broadcast %3 : vector<1x16xf32> to vector<128x16xf32>
    %5 = arith.addf %2, %4 : vector<128x16xf32>
    %cst_5 = arith.constant dense<0xFF800000> : vector<128xf32>
    %6 = vector.multi_reduction <maximumf>, %5, %cst_5 [1] : vector<128x16xf32> to vector<128xf32>
    %7 = vector.shape_cast %6 : vector<128xf32> to vector<128x1xf32>
    %8 = vector.broadcast %7 : vector<128x1xf32> to vector<128x16xf32>
    %9 = arith.subf %5, %8 : vector<128x16xf32>
    %10 = math.exp %9 : vector<128x16xf32>
    %cst_6 = arith.constant dense<0.000000e+00> : vector<128xf32>
    %11 = vector.multi_reduction <add>, %10, %cst_6 [1] : vector<128x16xf32> to vector<128xf32>
    %12 = vector.shape_cast %11 : vector<128xf32> to vector<128x1xf32>
    %13 = vector.extract_strided_slice %0 {offsets = [0, 32], sizes = [128, 16], strides = [1, 1]} : vector<128x48xf32> to vector<128x16xf32>
    %14 = arith.mulf %13, %10 : vector<128x16xf32>
    %cst_7 = arith.constant dense<0.000000e+00> : vector<128xf32>
    %15 = vector.multi_reduction <add>, %14, %cst_7 [1] : vector<128x16xf32> to vector<128xf32>
    %16 = vector.shape_cast %15 : vector<128xf32> to vector<128x1xf32>
    %17 = tpu.reciprocal %12 : vector<128x1xf32> -> vector<128x1xf32>
    %18 = arith.mulf %16, %17 : vector<128x1xf32>
    %c0_8 = arith.constant 0 : index
    %c0_9 = arith.constant 0 : index
    %19 = vector.load %arg4[%c0_8, %c0_9] : memref<128x1xf32, #tpu.memory_space<vmem>>, vector<128x1xf32>
    tpu.vector_store %arg4[%c0_8, %c0_9], %18 {strides = array<i32>} : memref<128x1xf32, #tpu.memory_space<vmem>>, vector<128x1xf32>,
    return
  }
  func.func @transform_0(%arg0: i32) -> (i32, i32) {
    %c0_i32 = arith.constant 0 : i32
    %c0_i32_0 = arith.constant 0 : i32
    return %arg0, %c0_i32 : i32, i32
  }
  func.func @transform_1(%arg0: i32) -> (i32, i32) {
    %c0_i32 = arith.constant 0 : i32
    %c0_i32_0 = arith.constant 0 : i32
    %c0_i32_1 = arith.constant 0 : i32
    return %c0_i32, %c0_i32_0 : i32, i32
  }
  func.func @transform_2(%arg0: i32) -> (i32, i32) {
    %c0_i32 = arith.constant 0 : i32
    %c0_i32_0 = arith.constant 0 : i32
    %c0_i32_1 = arith.constant 0 : i32
    return %c0_i32, %c0_i32_0 : i32, i32
  }
  func.func @transform_3(%arg0: i32) -> (i32, i32) {
    %c0_i32 = arith.constant 0 : i32
    %c0_i32_0 = arith.constant 0 : i32
    return %arg0, %c0_i32 : i32, i32
  }
}

</mosaic_0001>

<bundles_post_ra>
// kernel: tpu_custom_call.1
= control target key start
LH: loop header
LB: loop body
LE: loop exit
PB: predicated region body
PF: predicated region fallthrough
CT: control target
= control target key end

     0   :  { %s1114_s12 = smov 0   ;;  %s1711_s0 = inlined_call_operand.vmem [shape: f32[256,48], index: 0, kind: input, shape index: {}]   ;;  %s1712_s1 = inlined_call_operand.vmem [shape: f32[48,16], index: 1, kind: input, shape index: {}]   ;;  %s1713_s2 = inlined_call_operand.vmem [shape: f32[1,16], index: 2, kind: input, shape index: {}]   ;;  %s1714_s3 = inlined_call_operand.vmem [shape: f32[256,1], index: 3, kind: output, shape index: {}]  }
   0x1 LB: > { %s964_s13 = sadd.s32 4294967295, %s1090_s12   ;;  %p968_p0 = scmp.ge.s32.totalorder %s1090_s12, 1  ;;  %s1090_s12 = sphi %s1114_s12, %s13_s12  }
   0x2   : > { %p138_p1 = scmp.lt.s32.totalorder %s1090_s12, 3 }
   0x4   : > { %p139_p2 = pnand %p968_p0, %p138_p1 }
   0x5   : > { %s969_s18 = sshll.u32 (!%p139_p2), %s964_s13, 4  ;;  %s1092_s6 = smov (!%p139_p2), 32  }
   0x6   : > { %142 = sbr.rel (%p139_p2) target bundleno = 900 (0x384), region = 32  ;;  %p163_p3 = scmp.lt.s32.totalorder (!%p139_p2), %s969_s18, 31 }
   0x7   : > { %s1093_s7 = smov (!%p139_p2), 96  }
   0xb   : > { %v195_v0 = vld [vmem:[%s1712_s1 + $0x28] sm:$0xff]  ;;  %v194_v1 = vld [vmem:[%s1712_s1 + $0x20] sm:$0xff]  ;;  %v193_v2 = vld [vmem:[%s1712_s1 + $0x18] sm:$0xff]  ;;  %s1734_s18 = smov (!%p163_p3, %s969_s18), 31  ;;  %vm200_vm0 = vcmask 392192   ;;  %vm314_vm1 = vcmask 130048  }
   0xc   : > { %259 = vmatpush.msra.mxu0 %v195_v0  ;;  %991 = vmatpush.msra.mxu1 %v195_v0  ;;  %v192_v3 = vld [vmem:[%s1712_s1 + $0x10] sm:$0xff]  ;;  %s970_s23 = sshll.u32 %s1734_s18, 3  ;;  %v191_v4 = vld [vmem:[%s1712_s1 + $0x8] sm:$0xff]  ;;  %v190_v5 = vld [vmem:[%s1712_s1] sm:$0xff]  ;;  %vm891_vm14 = vcmask 7168  }
   0xd   : > { %993 = vmatpush.msra.mxu3 %v195_v0  ;;  %992 = vmatpush.msra.mxu2 %v195_v0  ;;  %s1145_s28 = scalar_lea.vmem %s1711_s0, %s970_s23  ;;  %v1233_v22 = vld [vmem:[%s1713_s2] ss:$0 sm:$0xff]  ;;  %s1530_s10 = scalar_lea.vmem %s1714_s3, %s970_s23 }
   0xe   : > { %260 = vmatpush.msra.mxu0 %v194_v1  ;;  %994 = vmatpush.msra.mxu1 %v194_v1  ;;  %v1151_v6 = vld [vmem:[%s1145_s28] sm:$0xff]  ;;  %v1171_v10 = vld [vmem:[%s1145_s28 + $0x8] sm:$0xff]  ;;  %v1191_v14 = vld [vmem:[%s1145_s28 + $0x10] sm:$0xff] }
   0xf   : > { %996 = vmatpush.msra.mxu3 %v194_v1  ;;  %995 = vmatpush.msra.mxu2 %v194_v1  ;;  %v1154_v7 = vld [vmem:[%s1145_s28 + $0x20] sm:$0xff]  ;;  %v1174_v11 = vld [vmem:[%s1145_s28 + $0x68] sm:$0xff]  ;;  %v1194_v15 = vld [vmem:[%s1145_s28 + $0x70] sm:$0xff] }
  0x10   : > { %261 = vmatpush.msra.mxu0 %v193_v2  ;;  %997 = vmatpush.msra.mxu1 %v193_v2  ;;  %v1157_v8 = vld [vmem:[%s1145_s28 + $0x60] sm:$0xff]  ;;  %v1177_v12 = vld [vmem:[%s1145_s28 + $0x28] sm:$0xff]  ;;  %v1197_v16 = vld [vmem:[%s1145_s28 + $0x30] sm:$0xff] }
  0x11   : > { %999 = vmatpush.msra.mxu3 %v193_v2  ;;  %998 = vmatpush.msra.mxu2 %v193_v2  ;;  %v1162_v9 = vld [vmem:[%s1145_s28 + $0x40] sm:$0xff]  ;;  %v1180_v13 = vld [vmem:[%s1145_s28 + $0x48] sm:$0xff]  ;;  %v1200_v17 = vld [vmem:[%s1145_s28 + $0x50] sm:$0xff] }
  0x12   : > { %262 = vmatpush.msra.mxu0 %v192_v3  ;;  %1000 = vmatpush.msra.mxu1 %v192_v3  ;;  %v1211_v18 = vld [vmem:[%s1145_s28 + $0x18] sm:$0xff] }
  0x13   : > { %1002 = vmatpush.msra.mxu3 %v192_v3  ;;  %1001 = vmatpush.msra.mxu2 %v192_v3  ;;  %v1214_v19 = vld [vmem:[%s1145_s28 + $0x78] sm:$0xff] }
  0x14   : > { %263 = vmatpush.msra.mxu0 %v191_v4  ;;  %1003 = vmatpush.msra.mxu1 %v191_v4  ;;  %v1217_v20 = vld [vmem:[%s1145_s28 + $0x38] sm:$0xff] }
  0x15   : > { %1005 = vmatpush.msra.mxu3 %v191_v4  ;;  %1004 = vmatpush.msra.mxu2 %v191_v4  ;;  %v1220_v21 = vld [vmem:[%s1145_s28 + $0x58] sm:$0xff] }
  0x16   : > { %264 = vmatpush.msra.mxu0 %v190_v5  ;;  %1006 = vmatpush.msra.mxu1 %v190_v5 }
  0x17   : > { %1008 = vmatpush.msra.mxu3 %v190_v5  ;;  %973 = vmatmul.msk.f32.vlgmr.msra.gmra.mxu0 %vm200_vm0, %v1151_v6 }
  0x18   : > { %977 = vmatmul.msk.f32.vlgmr.msra.gmra.mxu1 %vm200_vm0, %v1154_v7  ;;  %985 = vmatmul.msk.f32.vlgmr.msra.gmra.mxu3 %vm200_vm0, %v1157_v8 }
  0x19   : > { %1007 = vmatpush.msra.mxu2 %v190_v5 }
  0x1a   : > { %981 = vmatmul.msk.f32.vlgmr.msra.gmra.mxu2 %vm200_vm0, %v1162_v9 }
  0x1f   : > { %974 = vmatmul.msk.f32.gmra.mxu0 %vm200_vm0, %v1171_v10 }
  0x20   : > { %986 = vmatmul.msk.f32.gmra.mxu3 %vm200_vm0, %v1174_v11  ;;  %978 = vmatmul.msk.f32.gmra.mxu1 %vm200_vm0, %v1177_v12 }
  0x22   : > { %982 = vmatmul.msk.f32.gmra.mxu2 %vm200_vm0, %v1180_v13 }
  0x27   : > { %975 = vmatmul.msk.f32.gmra.mxu0 %vm200_vm0, %v1191_v14 }
  0x28   : > { %987 = vmatmul.msk.f32.gmra.mxu3 %vm200_vm0, %v1194_v15  ;;  %979 = vmatmul.msk.f32.gmra.mxu1 %vm200_vm0, %v1197_v16 }
  0x2a   : > { %983 = vmatmul.msk.f32.gmra.mxu2 %vm200_vm0, %v1200_v17 }
  0x2f   : > { %976 = vmatmul.msk.f32.gmra.mxu0 %vm200_vm0, %v1211_v18 }
  0x30   : > { %988 = vmatmul.msk.f32.gmra.mxu3 %vm200_vm0, %v1214_v19  ;;  %980 = vmatmul.msk.f32.gmra.mxu1 %vm200_vm0, %v1217_v20 }
  0x32   : > { %984 = vmatmul.msk.f32.gmra.mxu2 %vm200_vm0, %v1220_v21 }
  0x94   : > { %v266_v23 = vpop.f32.mrf.mxu0 }
  0x95   : > { %v1236_v24 = vadd.f32 %v1233_v22, %v266_v23  ;;  %v278_v25 = vpop.f32.mrf.mxu1 }
  0x96   : > { %v1239_v26 = vadd.f32 %v1233_v22, %v278_v25 }
  0x97   : > { %v315_v27 = vsel %vm314_vm1, %v1236_v24, -inf }
  0x98   : > { %v327_v28 = vsel %vm314_vm1, %v1239_v26, -inf  ;;  %316 = vmax.xlane.f32.xlu0 %v315_v27 }
  0x99   : > { %328 = vmax.xlane.f32.xlu2 %v327_v28 }
  0x9b   : > { %v302_v29 = vpop.f32.mrf.mxu3 }
  0x9c   : > { %v1246_v30 = vadd.f32 %v1233_v22, %v302_v29  ;;  %v269_v31 = vpop.f32.mrf.mxu0 }
  0x9d   : > { %v290_v32 = vpop.f32.mrf.mxu2  ;;  %v281_v35 = vpop.f32.mrf.mxu1  ;;  %v1256_v37 = vadd.f32 %v1233_v22, %v269_v31 }
  0x9e   : > { %v1249_v33 = vadd.f32 %v1233_v22, %v290_v32  ;;  %v351_v34 = vsel %vm314_vm1, %v1246_v30, -inf  ;;  %v1259_v38 = vadd.f32 %v1233_v22, %v281_v35 }
  0x9f   : > { %v318_v42 = vsel %vm314_vm1, %v1256_v37, -inf }
  0xa0   : > { %v339_v36 = vsel %vm314_vm1, %v1249_v33, -inf  ;;  %352 = vmax.xlane.f32.xlu0 %v351_v34  ;;  %v330_v45 = vsel %vm314_vm1, %v1259_v38, -inf }
  0xa1   : > { %340 = vmax.xlane.f32.xlu2 %v339_v36 }
  0xa3   : > { %v305_v39 = vpop.f32.mrf.mxu3 }
  0xa4   : > { %v1262_v40 = vadd.f32 %v1233_v22, %v305_v39  ;;  %v272_v43 = vpop.f32.mrf.mxu0 }
  0xa5   : > { %v293_v41 = vpop.f32.mrf.mxu2  ;;  %v1271_v46 = vadd.f32 %v1233_v22, %v272_v43  ;;  %v284_v54 = vpop.f32.mrf.mxu1 }
  0xa6   : > { %v354_v44 = vsel %vm314_vm1, %v1262_v40, -inf  ;;  %v1274_v47 = vadd.f32 %v1233_v22, %v293_v41  ;;  %v1289_v56 = vadd.f32 %v1233_v22, %v284_v54 }
  0xa7   : > { %355 = vmax.xlane.f32.xlu1 %v354_v44  ;;  %v321_v50 = vsel %vm314_vm1, %v1271_v46, -inf }
  0xa8   : > { %319 = vmax.xlane.f32.xlu0 %v318_v42  ;;  %v342_v52 = vsel %vm314_vm1, %v1274_v47, -inf  ;;  %v333_v59 = vsel %vm314_vm1, %v1289_v56, -inf }
  0xa9   : > { %331 = vmax.xlane.f32.xlu2 %v330_v45 }
  0xab   : > { %v308_v48 = vpop.f32.mrf.mxu3 }
  0xac   : > { %v1277_v49 = vadd.f32 %v1233_v22, %v308_v48  ;;  %v275_v60 = vpop.f32.mrf.mxu0 }
  0xad   : > { %v296_v51 = vpop.f32.mrf.mxu2  ;;  %v1301_v0 = vadd.f32 %v1233_v22, %v275_v60  ;;  %v287_v4 = vpop.f32.mrf.mxu1 }
  0xae   : > { %v357_v53 = vsel %vm314_vm1, %v1277_v49, -inf  ;;  %v1286_v55 = vadd.f32 %v1233_v22, %v296_v51  ;;  %v1311_v5 = vadd.f32 %v1233_v22, %v287_v4 }
  0xaf   : > { %322 = vmax.xlane.f32.xlu1 %v321_v50  ;;  %v324_v2 = vsel %vm314_vm1, %v1301_v0, -inf }
  0xb0   : > { %343 = vmax.xlane.f32.xlu0 %v342_v52  ;;  %v345_v57 = vsel %vm314_vm1, %v1286_v55, -inf  ;;  %v336_v23 = vsel %vm314_vm1, %v1311_v5, -inf }
  0xb1   : > { %358 = vmax.xlane.f32.xlu2 %v357_v53 }
  0xb3   : > { %v311_v62 = vpop.f32.mrf.mxu3 }
  0xb4   : > { %v1304_v1 = vadd.f32 %v1233_v22, %v311_v62 }
  0xb5   : > { %v299_v58 = vpop.f32.mrf.mxu2 }
  0xb6   : > { %v1296_v61 = vadd.f32 %v1233_v22, %v299_v58  ;;  %v360_v3 = vsel %vm314_vm1, %v1304_v1, -inf }
  0xb7   : > { %346 = vmax.xlane.f32.xlu1 %v345_v57 }
  0xb8   : > { %v348_v63 = vsel %vm314_vm1, %v1296_v61, -inf  ;;  %334 = vmax.xlane.f32.xlu0 %v333_v59 }
  0xb9   : > { %349 = vmax.xlane.f32.xlu2 %v348_v63 }
  0xbf   : > { %325 = vmax.xlane.f32.xlu1 %v324_v2 }
  0xc0   : > { %361 = vmax.xlane.f32.xlu0 %v360_v3 }
  0xc7   : > { %337 = vmax.xlane.f32.xlu1 %v336_v23 }
 0x10b   : > { %v317_v25 = vpop.xlane.xlu0 %316 }
 0x10c   : > { %v329_v27 = vpop.xlane.xlu2 %328  ;;  %v363_v28 = vsub.f32 %v1236_v24, %v317_v25 }
 0x10d   : > { %v367_v29 = vsub.f32 %v1239_v26, %v329_v27 }
 0x10e   : > { %v379_v31 = vmul.f32 1.442695, %v363_v28 }
 0x10f   : > { %v387_v32 = vmul.f32 1.442695, %v367_v29 }
 0x110   : > { %1020 = vpow2.f32 %v379_v31 }
 0x111   : > { %1022 = vpow2.f32 %v387_v32 }
 0x113   : > { %v353_v36 = vpop.xlane.xlu0 %352 }
 0x114   : > { %v375_v39 = vsub.f32 %v1246_v30, %v353_v36  ;;  %v341_v26 = vpop.xlane.xlu2 %340 }
 0x115   : > { %v371_v42 = vsub.f32 %v1249_v33, %v341_v26 }
 0x116   : > { %v1021_v34 = vpop.eup %1020  ;;  %v403_v24 = vmul.f32 1.442695, %v375_v39 }
 0x117   : > { %v1023_v35 = vpop.eup %1022  ;;  %475 = vrot.lane.b32.xlu2 %v1021_v34, %s1092_s6  ;;  %v411_v22 = vsel %vm314_vm1, %v1021_v34, 0.0  ;;  %v395_v43 = vmul.f32 1.442695, %v371_v42 }
 0x118   : > { %483 = vrot.lane.b32.xlu0 %v1023_v35, %s1092_s6  ;;  %412 = vadd.xlane.f32.xlu1 %v411_v22  ;;  %1024 = vpow2.f32 %v403_v24  ;;  %v423_v45 = vsel %vm314_vm1, %v1023_v35, 0.0 }
 0x119   : > { %1026 = vpow2.f32 %v395_v43 }
 0x11b   : > { %v320_v50 = vpop.xlane.xlu0 %319 }
 0x11c   : > { %v364_v30 = vsub.f32 %v1256_v37, %v320_v50  ;;  %v332_v52 = vpop.xlane.xlu2 %331 }
 0x11d   : > { %v368_v53 = vsub.f32 %v1259_v38, %v332_v52  ;;  %v356_v38 = vpop.xlane.xlu1 %355 }
 0x11e   : > { %v1025_v41 = vpop.eup %1024  ;;  %v381_v51 = vmul.f32 1.442695, %v364_v30  ;;  %v376_v63 = vsub.f32 %v1262_v40, %v356_v38 }
 0x11f   : > { %v1027_v44 = vpop.eup %1026  ;;  %v389_v54 = vmul.f32 1.442695, %v368_v53  ;;  %v447_v57 = vsel %vm314_vm1, %v1025_v41, 0.0 }
 0x120   : > { %v435_v48 = vsel %vm314_vm1, %v1027_v44, 0.0  ;;  %1028 = vpow2.f32 %v381_v51  ;;  %v405_v3 = vmul.f32 1.442695, %v376_v63 }
 0x121   : > { %1030 = vpow2.f32 %v389_v54 }
 0x123   : > { %v344_v59 = vpop.xlane.xlu0 %343 }
 0x124   : > { %v372_v37 = vsub.f32 %v1274_v47, %v344_v59  ;;  %v359_v47 = vpop.xlane.xlu2 %358 }
 0x125   : > { %v377_v27 = vsub.f32 %v1277_v49, %v359_v47  ;;  %v323_v29 = vpop.xlane.xlu1 %322 }
 0x126   : > { %v1029_v33 = vpop.eup %1028  ;;  %v397_v60 = vmul.f32 1.442695, %v372_v37  ;;  %v365_v32 = vsub.f32 %v1271_v46, %v323_v29 }
 0x127   : > { %v1031_v58 = vpop.eup %1030  ;;  %v414_v4 = vsel %vm314_vm1, %v1029_v33, 0.0  ;;  %v407_v40 = vmul.f32 1.442695, %v377_v27 }
 0x128   : > { %1032 = vpow2.f32 %v397_v60  ;;  %v426_v2 = vsel %vm314_vm1, %v1031_v58, 0.0  ;;  %v383_v34 = vmul.f32 1.442695, %v365_v32 }
 0x129   : > { %1034 = vpow2.f32 %v405_v3 }
 0x12a   : > { %1036 = vpow2.f32 %v407_v40 }
 0x12b   : > { %v335_v35 = vpop.xlane.xlu0 %334  ;;  %1038 = vpow2.f32 %v383_v34 }
 0x12c   : > { %v369_v22 = vsub.f32 %v1289_v56, %v335_v35  ;;  %v350_v37 = vpop.xlane.xlu2 %349 }
 0x12d   : > { %v347_v49 = vpop.xlane.xlu1 %346  ;;  %v374_v60 = vsub.f32 %v1296_v61, %v350_v37 }
 0x12e   : > { %v1033_v62 = vpop.eup %1032  ;;  %v391_v36 = vmul.f32 1.442695, %v369_v22  ;;  %v373_v46 = vsub.f32 %v1286_v55, %v347_v49 }
 0x12f   : > { %v1035_v23 = vpop.eup %1034  ;;  %v438_v28 = vsel %vm314_vm1, %v1033_v62, 0.0 }
 0x130   : > { %v450_v25 = vsel %vm314_vm1, %v1035_v23, 0.0  ;;  %v1037_v31 = vpop.eup %1036  ;;  %1040 = vpow2.f32 %v391_v36 }
 0x131   : > { %499 = vrot.lane.b32.xlu1 %v1025_v41, %s1092_s6  ;;  %v1039_v39 = vpop.eup %1038  ;;  %v399_v41 = vmul.f32 1.442695, %v373_v46  ;;  %v453_v52 = vsel %vm314_vm1, %v1037_v31, 0.0 }
 0x132   : > { %v417_v24 = vsel %vm314_vm1, %v1039_v39, 0.0 }
 0x133   : > { %1042 = vpow2.f32 %v399_v41  ;;  %v362_v30 = vpop.xlane.xlu0 %361 }
 0x134   : > { %v378_v51 = vsub.f32 %v1304_v1, %v362_v30 }
 0x135   : > { %v326_v56 = vpop.xlane.xlu1 %325 }
 0x136   : > { %v1041_v26 = vpop.eup %1040 }
 0x139   : > { %v1043_v42 = vpop.eup %1042 }
 0x13a   : > { %v441_v43 = vsel %vm314_vm1, %v1043_v42, 0.0 }
 0x13d   : > { %v338_v53 = vpop.xlane.xlu1 %337 }
 0x140   : > { %424 = vadd.xlane.f32.xlu2 %v423_v45 }
 0x142   : > { %436 = vadd.xlane.f32.xlu0 %v435_v48  ;;  %v429_v48 = vsel %vm314_vm1, %v1041_v26, 0.0 }
 0x156   : > { %477 = vrot.lane.b32.xlu0 %v1029_v33, %s1092_s6  ;;  %v409_v33 = vmul.f32 1.442695, %v378_v51 }
 0x158   : > { %491 = vrot.lane.b32.xlu2 %v1027_v44, %s1092_s6  ;;  %v366_v44 = vsub.f32 %v1301_v0, %v326_v56  ;;  %v370_v0 = vsub.f32 %v1311_v5, %v338_v53  ;;  %v401_v5 = vmul.f32 1.442695, %v374_v60 }
 0x15a   : > { %v385_v45 = vmul.f32 1.442695, %v366_v44  ;;  %v393_v54 = vmul.f32 1.442695, %v370_v0 }
 0x15b   : > { %448 = vadd.xlane.f32.xlu1 %v447_v57 }
 0x15c   : > { %1044 = vpow2.f32 %v385_v45 }
 0x15d   : > { %1046 = vpow2.f32 %v409_v33 }
 0x15e   : > { %1048 = vpow2.f32 %v393_v54 }
 0x15f   : > { %1050 = vpow2.f32 %v401_v5 }
 0x160   : > { %485 = vrot.lane.b32.xlu2 %v1031_v58, %s1092_s6 }
 0x162   : > { %v1045_v50 = vpop.eup %1044 }
 0x163   : > { %v420_v55 = vsel %vm314_vm1, %v1045_v50, 0.0  ;;  %v1047_v57 = vpop.eup %1046 }
 0x164   : > { %v1049_v58 = vpop.eup %1048  ;;  %v456_v61 = vsel %vm314_vm1, %v1047_v57, 0.0 }
 0x165   : > { %v432_v59 = vsel %vm314_vm1, %v1049_v58, 0.0  ;;  %v1051_v3 = vpop.eup %1050 }
 0x166   : > { %v444_v29 = vsel %vm314_vm1, %v1051_v3, 0.0 }
 0x171   : > { %v476_v38 = vpop.permute.xlu2 %475 }
 0x172   : > { %v523_v49 = vmul.f32 %v476_v38, %v1151_v6 }
 0x174   : > { %493 = vrot.lane.b32.xlu1 %v1033_v62, %s1092_s6 }
 0x180   : > { %427 = vadd.xlane.f32.xlu0 %v426_v2 }
 0x189   : > { %415 = vadd.xlane.f32.xlu2 %v414_v4 }
 0x18a   : > { %v484_v1 = vpop.permute.xlu0 %483 }
 0x191   : > { %451 = vadd.xlane.f32.xlu2 %v450_v25  ;;  %v527_v25 = vmul.f32 %v484_v1, %v1154_v7 }
 0x194   : > { %501 = vrot.lane.b32.xlu0 %v1035_v23, %s1092_s6  ;;  %v1367_v23 = vpop.xlane.xlu1 %412 }
 0x195   : > { %vm656_vm2 = vweird.f32 %v1367_v23 }
 0x19e   : > { %439 = vadd.xlane.f32.xlu1 %v438_v28 }
 0x1a3   : > { %v500_v28 = vpop.permute.xlu1 %499 }
 0x1a4   : > { %v535_v46 = vmul.f32 %v500_v28, %v1157_v8 }
 0x1a9   : > { %503 = vrot.lane.b32.xlu2 %v1037_v31, %s1092_s6 }
 0x1b3   : > { %v1362_v2 = vpop.xlane.xlu2 %424 }
 0x1b4   : > { %1052 = vrcp.f32 %v1362_v2  ;;  %vm712_vm4 = vweird.f32 %v1362_v2 }
 0x1b5   : > { %v1360_v62 = vpop.xlane.xlu0 %436  ;;  %1054 = vrcp.f32 %v1367_v23 }
 0x1b6   : > { %1056 = vrcp.f32 %v1360_v62  ;;  %vm768_vm11 = vweird.f32 %v1360_v62 }
 0x1b7   : > { %479 = vrot.lane.b32.xlu1 %v1039_v39, %s1092_s6 }
 0x1bb   : > { %v492_v47 = vpop.permute.xlu2 %491 }
 0x1bc   : > { %v531_v39 = vmul.f32 %v492_v47, %v1162_v9 }
 0x1be   : > { %418 = vadd.xlane.f32.xlu0 %v417_v24 }
 0x1bf   : > { %487 = vrot.lane.b32.xlu1 %v1041_v26, %s1092_s6 }
 0x1c3   : > { %v486_v31 = vpop.permute.xlu2 %485 }
 0x1c4   : > { %v528_v26 = vmul.f32 %v486_v31, %v1177_v12 }
 0x1c8   : > { %v478_v63 = vpop.permute.xlu0 %477 }
 0x1c9   : > { %v524_v40 = vmul.f32 %v478_v63, %v1171_v10 }
 0x1ce   : > { %v1377_v7 = vpop.xlane.xlu1 %448 }
 0x1d2   : > { %495 = vrot.lane.b32.xlu0 %v1043_v42, %s1092_s6  ;;  %442 = vadd.xlane.f32.xlu2 %v441_v43 }
 0x1e6   : > { %v494_v36 = vpop.permute.xlu1 %493 }
 0x1e7   : > { %v532_v41 = vmul.f32 %v494_v36, %v1180_v13 }
 0x1e9   : > { %430 = vadd.xlane.f32.xlu1 %v429_v48 }
 0x1ea   : > { %481 = vrot.lane.b32.xlu2 %v1045_v50, %s1092_s6 }
 0x1f1   : > { %421 = vadd.xlane.f32.xlu1 %v420_v55 }
 0x1f3   : > { %v1365_v4 = vpop.xlane.xlu0 %427 }
 0x1fc   : > { %454 = vadd.xlane.f32.xlu0 %v453_v52  ;;  %v1380_v35 = vpop.xlane.xlu2 %415 }
 0x1fd   : > { %1058 = vrcp.f32 %v1380_v35 }
 0x1fe   : > { %1060 = vrcp.f32 %v1377_v7 }
 0x1ff   : > { %1062 = vrcp.f32 %v1365_v4 }
 0x204   : > { %v1387_v24 = vpop.xlane.xlu2 %451 }
 0x206   : > { %v502_v27 = vpop.permute.xlu0 %501 }
 0x207   : > { %v536_v34 = vmul.f32 %v502_v27, %v1174_v11 }
 0x20a   : > { %505 = vrot.lane.b32.xlu1 %v1047_v57, %s1092_s6 }
 0x20c   : > { %v504_v9 = vpop.permute.xlu2 %503 }
 0x20d   : > { %v537_v12 = vmul.f32 %v504_v9, %v1194_v15 }
 0x210   : > { %489 = vrot.lane.b32.xlu0 %v1049_v58, %s1092_s6 }
 0x211   : > { %v1391_v11 = vpop.xlane.xlu1 %439 }
 0x213   : > { %433 = vadd.xlane.f32.xlu2 %v432_v59 }
 0x22b   : > { %497 = vrot.lane.b32.xlu2 %v1051_v3, %s1092_s6 }
 0x231   : > { %v1375_v32 = vpop.xlane.xlu0 %418 }
 0x233   : > { %563 = vrot.lane.b32.xlu2 %v527_v25, %s1093_s7 }
 0x234   : > { %457 = vadd.xlane.f32.xlu1 %v456_v61 }
 0x23a   : > { %445 = vadd.xlane.f32.xlu0 %v444_v29 }
 0x23b   : > { %557 = vrot.lane.b32.xlu2 %v524_v40, %s1093_s7 }
 0x243   : > { %581 = vrot.lane.b32.xlu2 %v536_v34, %s1093_s7 }
 0x244   : > { %v496_v22 = vpop.permute.xlu0 %495 }
 0x245   : > { %v533_v10 = vmul.f32 %v496_v22, %v1200_v17  ;;  %v480_v17 = vpop.permute.xlu1 %479  ;;  %v1401_v42 = vpop.xlane.xlu2 %442 }
 0x246   : > { %v525_v6 = vmul.f32 %v480_v17, %v1191_v14  ;;  %1064 = vrcp.f32 %v1401_v42 }
 0x247   : > { %1066 = vrcp.f32 %v1391_v11 }
 0x248   : > { %1068 = vrcp.f32 %v1375_v32 }
 0x24b   : > { %575 = vrot.lane.b32.xlu2 %v533_v10, %s1093_s7 }
 0x24d   : > { %571 = vrot.lane.b32.xlu1 %v531_v39, %s1093_s7  ;;  %v488_v43 = vpop.permute.xlu1 %487  ;;  %v482_v56 = vpop.permute.xlu2 %481 }
 0x24e   : > { %555 = vrot.lane.b32.xlu0 %v523_v49, %s1093_s7  ;;  %v529_v8 = vmul.f32 %v488_v43, %v1197_v16  ;;  %v526_v13 = vmul.f32 %v482_v56, %v1211_v18 }
 0x255   : > { %565 = vrot.lane.b32.xlu1 %v528_v26, %s1093_s7 }
 0x256   : > { %579 = vrot.lane.b32.xlu0 %v535_v46, %s1093_s7  ;;  %v1053_v46 = vpop.eup %1052 }
 0x257   : > { %v1446_v9 = vpop.eup %1054  ;;  %v708_v17 = vmul.f32 %v1053_v46, %v1362_v2  ;;  %vm713_vm3 = vweird.f32 %v1053_v46 }
 0x258   : > { %vm1483_vm5 = vmor %vm712_vm4, %vm713_vm3  ;;  %vm657_vm6 = vweird.f32 %v1446_v9  ;;  %vm824_vm3 = vweird.f32 %v1377_v7 }
 0x259   : > { %v709_v43 = vsub.f32 1.0, %v708_v17  ;;  %vm1504_vm10 = vmor %vm656_vm2, %vm657_vm6 }
 0x25c   : > { %v1407_v44 = vpop.xlane.xlu1 %430 }
 0x25d   : > { %559 = vrot.lane.b32.xlu1 %v525_v6, %s1093_s7  ;;  %v1450_v6 = vpop.eup %1056  ;;  %1070 = vrcp.f32 %v1407_v44 }
 0x25e   : > { %573 = vrot.lane.b32.xlu0 %v532_v41, %s1093_s7  ;;  %v652_v41 = vmul.f32 %v1446_v9, %v1367_v23  ;;  %vm769_vm8 = vweird.f32 %v1450_v6 }
 0x25f   : > { %vm1515_vm12 = vmor %vm768_vm11, %vm769_vm8 }
 0x264   : > { %v1411_v14 = vpop.xlane.xlu1 %421 }
 0x265   : > { %583 = vrot.lane.b32.xlu1 %v537_v12, %s1093_s7  ;;  %v764_v12 = vmul.f32 %v1450_v6, %v1360_v62 }
 0x266   : > { %567 = vrot.lane.b32.xlu0 %v529_v8, %s1093_s7  ;;  %v1458_v8 = vpop.eup %1058 }
 0x267   : > { %v1460_v56 = vpop.eup %1060  ;;  %vm671_vm0 = vweird.f32 %v1458_v8 }
 0x268   : > { %vm825_vm15 = vweird.f32 %v1460_v56 }
 0x269   : > { %vm1567_vm4 = vmor %vm824_vm3, %vm825_vm15  ;;  %vm782_vm3 = vweird.f32 %v1391_v11 }
 0x26e   : > { %561 = vrot.lane.b32.xlu0 %v526_v13, %s1093_s7  ;;  %v653_v13 = vsub.f32 1.0, %v652_v41  ;;  %v676_v41 = vand.u32 2147483648, %v1380_v35 }
 0x26f   : > { %v1413_v45 = vpop.xlane.xlu0 %454 }
 0x27c   : > { %v506_v48 = vpop.permute.xlu1 %505 }
 0x27d   : > { %v538_v15 = vmul.f32 %v506_v48, %v1214_v19  ;;  %v765_v48 = vsub.f32 1.0, %v764_v12 }
 0x27f   : > { %585 = vrot.lane.b32.xlu0 %v538_v15, %s1093_s7  ;;  %v710_v15 = vmul.f32 %v1053_v46, %v709_v43 }
 0x282   : > { %v490_v16 = vpop.permute.xlu0 %489 }
 0x283   : > { %v530_v50 = vmul.f32 %v490_v16, %v1217_v20  ;;  %v666_v16 = vmul.f32 %v1458_v8, %v1380_v35 }
 0x285   : > { %569 = vrot.lane.b32.xlu2 %v530_v50, %s1093_s7  ;;  %v820_v50 = vmul.f32 %v1460_v56, %v1377_v7 }
 0x286   : > { %v1419_v55 = vpop.xlane.xlu2 %433 }
 0x287   : > { %1072 = vrcp.f32 %v1419_v55 }
 0x288   : > { %1074 = vrcp.f32 %v1411_v14 }
 0x289   : > { %1076 = vrcp.f32 %v1387_v24 }
 0x28e   : > { %v498_v30 = vpop.permute.xlu2 %497 }
 0x28f   : > { %v534_v18 = vmul.f32 %v498_v30, %v1220_v21  ;;  %v1467_v30 = vpop.eup %1062 }
 0x291   : > { %577 = vrot.lane.b32.xlu1 %v534_v18, %s1093_s7  ;;  %v654_v18 = vmul.f32 %v1446_v9, %v653_v13  ;;  %v674_v13 = vand.u32 2147483647, %v1380_v35 }
 0x293   : > { %vm675_vm6 = vcmp.eq.f32.partialorder %v674_v13, 8.507059e+37  ;;  %v786_v13 = vand.u32 2147483647, %v1391_v11 }
 0x296   : > { %v564_v51 = vpop.permute.xlu2 %563 }
 0x297   : > { %v615_v19 = vsel %vm314_vm1, %v564_v51, 0.0  ;;  %v660_v51 = vand.u32 2147483647, %v1367_v23 }
 0x299   : > { %vm1493_vm7 = vcmp.eq.f32.partialorder %v660_v51, 8.507059e+37 }
 0x29e   : > { %v558_v52 = vpop.permute.xlu2 %557 }
 0x29f   : > { %v606_v21 = vsel %vm314_vm1, %v558_v52, 0.0  ;;  %v711_v52 = vadd.f32 %v1053_v46, %v710_v15 }
 0x2a6   : > { %v582_v0 = vpop.permute.xlu2 %581 }
 0x2a7   : > { %v1423_v53 = vpop.xlane.xlu1 %457  ;;  %v642_v34 = vsel %vm314_vm1, %v582_v0, 0.0  ;;  %v766_v0 = vmul.f32 %v1450_v6, %v765_v48 }
 0x2a8   : > { %1078 = vrcp.f32 %v1423_v53 }
 0x2ad   : > { %v1425_v33 = vpop.xlane.xlu0 %445 }
 0x2ae   : > { %v576_v59 = vpop.permute.xlu2 %575  ;;  %1080 = vrcp.f32 %v1425_v33 }
 0x2af   : > { %v633_v5 = vsel %vm314_vm1, %v576_v59, 0.0  ;;  %v716_v59 = vand.u32 2147483647, %v1362_v2  ;;  %1082 = vrcp.f32 %v1413_v45 }
 0x2b1   : > { %vm717_vm9 = vcmp.eq.f32.partialorder %v716_v59, 8.507059e+37 }
 0x2bb   : > { %616 = vadd.xlane.f32.xlu1 %v615_v19  ;;  %v662_v19 = vand.u32 2147483648, %v1367_v23 }
 0x2bf   : > { %v572_v20 = vpop.permute.xlu1 %571 }
 0x2c0   : > { %v556_v54 = vpop.permute.xlu0 %555  ;;  %v627_v57 = vsel %vm314_vm1, %v572_v20, 0.0  ;;  %v667_v20 = vsub.f32 1.0, %v666_v16 }
 0x2c1   : > { %628 = vadd.xlane.f32.xlu0 %v627_v57  ;;  %v603_v58 = vsel %vm314_vm1, %v556_v54, 0.0  ;;  %v718_v54 = vand.u32 2147483648, %v1362_v2  ;;  %v1477_v57 = vpop.eup %1064  ;;  %v767_v2 = vadd.f32 %v1450_v6, %v766_v0  ;;  %v677_v0 = vor.u32 1.1754944e-38, %v676_v41 }
 0x2c2   : > { %604 = vadd.xlane.f32.xlu2 %v603_v58  ;;  %v821_v58 = vsub.f32 1.0, %v820_v50 }
 0x2c3   : > { %607 = vadd.xlane.f32.xlu1 %v606_v21  ;;  %v722_v21 = vmul.f32 %v1467_v30, %v1365_v4 }
 0x2c7   : > { %v566_v1 = vpop.permute.xlu1 %565 }
 0x2c8   : > { %v580_v37 = vpop.permute.xlu0 %579  ;;  %v618_v60 = vsel %vm314_vm1, %v566_v1, 0.0 }
 0x2c9   : > { %619 = vadd.xlane.f32.xlu0 %v618_v60  ;;  %v639_v38 = vsel %vm314_vm1, %v580_v37, 0.0  ;;  %v655_v37 = vadd.f32 %v1446_v9, %v654_v18  ;;  %v772_v60 = vand.u32 2147483647, %v1360_v62  ;;  %v828_v18 = vand.u32 2147483647, %v1377_v7 }
 0x2ca   : > { %640 = vadd.xlane.f32.xlu2 %v639_v38  ;;  %v774_v38 = vand.u32 2147483648, %v1360_v62 }
 0x2cb   : > { %634 = vadd.xlane.f32.xlu1 %v633_v5  ;;  %v715_v5 = vsel %vm1483_vm5, %v1053_v46, %v711_v52  ;;  %vm1519_vm13 = vcmp.eq.f32.partialorder %v772_v60, 8.507059e+37  ;;  %vm727_vm5 = vweird.f32 %v1467_v30  ;;  %v732_v60 = vand.u32 2147483648, %v1365_v4 }
 0x2cc   : > { %vm829_vm11 = vcmp.eq.f32.partialorder %v828_v18, 8.507059e+37 }
 0x2cf   : > { %v560_v63 = vpop.permute.xlu1 %559 }
 0x2d0   : > { %v574_v3 = vpop.permute.xlu0 %573  ;;  %v609_v25 = vsel %vm314_vm1, %v560_v63, 0.0 }
 0x2d1   : > { %610 = vadd.xlane.f32.xlu0 %v609_v25  ;;  %v630_v47 = vsel %vm314_vm1, %v574_v3, 0.0  ;;  %v792_v3 = vmul.f32 %v1477_v57, %v1401_v42  ;;  %v719_v25 = vor.u32 1.1754944e-38, %v718_v54 }
 0x2d2   : > { %631 = vadd.xlane.f32.xlu2 %v630_v47  ;;  %v663_v47 = vor.u32 1.1754944e-38, %v662_v19 }
 0x2d7   : > { %v584_v10 = vpop.permute.xlu1 %583 }
 0x2d8   : > { %v568_v61 = vpop.permute.xlu0 %567  ;;  %v645_v26 = vsel %vm314_vm1, %v584_v10, 0.0 }
 0x2d9   : > { %v621_v27 = vsel %vm314_vm1, %v568_v61, 0.0  ;;  %v668_v61 = vmul.f32 %v1458_v8, %v667_v20 }
 0x2da   : > { %622 = vadd.xlane.f32.xlu2 %v621_v27  ;;  %v723_v27 = vsub.f32 1.0, %v722_v21 }
 0x2dc   : > { %v724_v12 = vmul.f32 %v1467_v30, %v723_v27 }
 0x2de   : > { %v725_v54 = vadd.f32 %v1467_v30, %v724_v12  ;;  %v788_v12 = vand.u32 2147483648, %v1391_v11 }
 0x2df   : > { %v570_v28 = vpop.permute.xlu2 %569 }
 0x2e0   : > { %v562_v40 = vpop.permute.xlu0 %561  ;;  %v624_v29 = vsel %vm314_vm1, %v570_v28, 0.0  ;;  %v733_v28 = vor.u32 1.1754944e-38, %v732_v60  ;;  %v789_v18 = vor.u32 1.1754944e-38, %v788_v12 }
 0x2e1   : > { %625 = vadd.xlane.f32.xlu1 %v624_v29  ;;  %v612_v31 = vsel %vm314_vm1, %v562_v40, 0.0  ;;  %v822_v40 = vmul.f32 %v1460_v56, %v821_v58  ;;  %v1510_v29 = vpop.eup %1066 }
 0x2e2   : > { %613 = vadd.xlane.f32.xlu2 %v612_v31  ;;  %v720_v31 = vsel %vm717_vm9, %v719_v25, %v715_v5  ;;  %v1523_v10 = vpop.eup %1068  ;;  %v778_v17 = vmul.f32 %v1510_v29, %v1391_v11  ;;  %vm797_vm9 = vweird.f32 %v1477_v57  ;;  %v802_v25 = vand.u32 2147483648, %v1401_v42 }
 0x2e3   : > { %v823_v43 = vadd.f32 %v1460_v56, %v822_v40  ;;  %vm783_vm15 = vweird.f32 %v1510_v29 }
 0x2e4   : > { %v779_v52 = vsub.f32 1.0, %v778_v17  ;;  %v690_v17 = vand.u32 2147483648, %v1375_v32 }
 0x2e5   : > { %v827_v21 = vsel %vm1567_vm4, %v1460_v56, %v823_v43 }
 0x2e9   : > { %643 = vadd.xlane.f32.xlu1 %v642_v34  ;;  %v659_v34 = vsel %vm1504_vm10, %v1446_v9, %v655_v37  ;;  %v669_v9 = vadd.f32 %v1458_v8, %v668_v61  ;;  %vm796_vm10 = vweird.f32 %v1401_v42 }
 0x2ea   : > { %v664_v48 = vsel %vm1493_vm7, %v663_v47, %v659_v34  ;;  %vm726_vm7 = vweird.f32 %v1365_v4  ;;  %v780_v47 = vmul.f32 %v1510_v29, %v779_v52 }
 0x2eb   : > { %vm1582_vm8 = vmor %vm726_vm7, %vm727_vm5  ;;  %vm787_vm7 = vcmp.eq.f32.partialorder %v786_v13, 8.507059e+37 }
 0x2ec   : > { %v781_v23 = vadd.f32 %v1510_v29, %v780_v47  ;;  %vm784_vm5 = vmor %vm782_vm3, %vm783_vm15  ;;  %vm754_vm15 = vweird.f32 %v1419_v55  ;;  %v704_v47 = vand.u32 2147483648, %v1411_v14 }
 0x2ee   : > { %v785_v16 = vsel %vm784_vm5, %v1510_v29, %v781_v23 }
 0x2f1   : > { %v586_v22 = vpop.permute.xlu0 %585 }
 0x2f2   : > { %v648_v36 = vsel %vm314_vm1, %v586_v22, 0.0 }
 0x2f3   : > { %649 = vadd.xlane.f32.xlu2 %v648_v36  ;;  %v775_v36 = vor.u32 1.1754944e-38, %v774_v38  ;;  %v1578_v38 = vpop.eup %1070 }
 0x2f4   : > { %v736_v27 = vmul.f32 %v1578_v38, %v1407_v44 }
 0x303   : > { %v578_v39 = vpop.permute.xlu1 %577 }
 0x304   : > { %v636_v49 = vsel %vm314_vm1, %v578_v39, 0.0  ;;  %v771_v39 = vsel %vm1515_vm12, %v1450_v6, %v767_v2  ;;  %v680_v6 = vmul.f32 %v1523_v10, %v1375_v32  ;;  %vm670_vm1 = vweird.f32 %v1380_v35  ;;  %vm1605_vm12 = vmor %vm796_vm10, %vm797_vm9 }
 0x305   : > { %637 = vadd.xlane.f32.xlu0 %v636_v49  ;;  %v830_v49 = vand.u32 2147483648, %v1377_v7  ;;  %v776_v15 = vsel %vm1519_vm13, %v775_v36, %v771_v39  ;;  %vm1555_vm2 = vmor %vm670_vm1, %vm671_vm0  ;;  %v730_v2 = vand.u32 2147483647, %v1365_v4  ;;  %v800_v4 = vand.u32 2147483647, %v1401_v42 }
 0x306   : > { %v673_v50 = vsel %vm1555_vm2, %v1458_v8, %v669_v9  ;;  %v681_v8 = vsub.f32 1.0, %v680_v6  ;;  %v803_v42 = vor.u32 1.1754944e-38, %v802_v25  ;;  %vm685_vm1 = vweird.f32 %v1523_v10 }
 0x307   : > { %v831_v51 = vor.u32 1.1754944e-38, %v830_v49  ;;  %v678_v1 = vsel %vm675_vm6, %v677_v0, %v673_v50  ;;  %vm731_vm13 = vcmp.eq.f32.partialorder %v730_v2, 8.507059e+37  ;;  %vm801_vm0 = vcmp.eq.f32.partialorder %v800_v4, 8.507059e+37  ;;  %v1616_v49 = vpop.eup %1072 }
 0x308   : > { %v682_v61 = vmul.f32 %v1523_v10, %v681_v8  ;;  %v1619_v41 = vpop.eup %1074  ;;  %vm684_vm2 = vweird.f32 %v1375_v32  ;;  %v688_v6 = vand.u32 2147483647, %v1375_v32  ;;  %v691_v50 = vor.u32 1.1754944e-38, %v690_v17 }
 0x309   : > { %v832_v40 = vsel %vm829_vm11, %v831_v51, %v827_v21  ;;  %vm686_vm4 = vmor %vm684_vm2, %vm685_vm1  ;;  %vm740_vm9 = vweird.f32 %v1407_v44  ;;  %vm698_vm1 = vweird.f32 %v1411_v14 }
 0x30a   : > { %v683_v39 = vadd.f32 %v1523_v10, %v682_v61  ;;  %vm689_vm6 = vcmp.eq.f32.partialorder %v688_v6, 8.507059e+37  ;;  %v702_v61 = vand.u32 2147483647, %v1411_v14  ;;  %v870_v6 = vand.u32 2147483647, %v1423_v53 }
 0x30c   : > { %v687_v32 = vsel %vm686_vm4, %v1523_v10, %v683_v39  ;;  %v1644_v10 = vpop.eup %1076  ;;  %vm703_vm4 = vcmp.eq.f32.partialorder %v702_v61, 8.507059e+37  ;;  %v844_v39 = vand.u32 2147483648, %v1387_v24 }
 0x30d   : > { %646 = vadd.xlane.f32.xlu0 %v645_v26  ;;  %v793_v26 = vsub.f32 1.0, %v792_v3  ;;  %v729_v3 = vsel %vm1582_vm8, %v1467_v30, %v725_v54  ;;  %v692_v51 = vsel %vm689_vm6, %v691_v50, %v687_v32  ;;  %vm741_vm8 = vweird.f32 %v1578_v38  ;;  %v1079_v4 = vpop.eup %1078 }
 0x30e   : > { %v734_v34 = vsel %vm731_vm13, %v733_v28, %v729_v3  ;;  %v834_v21 = vmul.f32 %v1644_v10, %v1387_v24  ;;  %vm742_vm10 = vmor %vm740_vm9, %vm741_vm8  ;;  %v760_v3 = vand.u32 2147483648, %v1419_v55  ;;  %vm699_vm13 = vweird.f32 %v1619_v41  ;;  %v1081_v13 = vpop.eup %1080 }
 0x30f   : > { %v794_v35 = vmul.f32 %v1477_v57, %v793_v26  ;;  %v737_v26 = vsub.f32 1.0, %v736_v27  ;;  %vm700_vm2 = vmor %vm698_vm1, %vm699_vm13  ;;  %vm839_vm5 = vweird.f32 %v1644_v10  ;;  %vm838_vm6 = vweird.f32 %v1387_v24 }
 0x310   : > { %v761_v30 = vor.u32 1.1754944e-38, %v760_v3  ;;  %vm867_vm9 = vweird.f32 %v1079_v4  ;;  %vm811_vm13 = vweird.f32 %v1081_v13 }
 0x311   : > { %v795_v56 = vadd.f32 %v1477_v57, %v794_v35  ;;  %v738_v11 = vmul.f32 %v1578_v38, %v737_v26  ;;  %v842_v26 = vand.u32 2147483647, %v1387_v24  ;;  %v872_v24 = vand.u32 2147483648, %v1423_v53 }
 0x313   : > { %v739_v29 = vadd.f32 %v1578_v38, %v738_v11  ;;  %vm843_vm8 = vcmp.eq.f32.partialorder %v842_v26, 8.507059e+37  ;;  %v873_v32 = vor.u32 1.1754944e-38, %v872_v24 }
 0x32e   : > { %v617_v62 = vpop.xlane.xlu1 %616 }
 0x32f   : > { %v879_v46 = vmul.f32 %v720_v31, %v617_v62  ;;  %v799_v31 = vsel %vm1605_vm12, %v1477_v57, %v795_v56  ;;  %vm755_vm12 = vweird.f32 %v1616_v49 }
 0x331   : > { %896 = vst.msk [vmem:[%s1530_s10 + $0x20] sm:$0xff] %vm891_vm14, %v879_v46  ;;  %v804_v46 = vsel %vm801_vm0, %v803_v42, %v799_v31  ;;  %vm756_vm0 = vmor %vm754_vm15, %vm755_vm12  ;;  %v705_v31 = vor.u32 1.1754944e-38, %v704_v47  ;;  %vm871_vm12 = vcmp.eq.f32.partialorder %v870_v6, 8.507059e+37  ;;  %vm810_vm15 = vweird.f32 %v1425_v33 }
 0x334   : > { %v629_v19 = vpop.xlane.xlu0 %628 }
 0x335   : > { %v605_v58 = vpop.xlane.xlu2 %604  ;;  %v883_v7 = vmul.f32 %v776_v15, %v629_v19  ;;  %v694_v15 = vmul.f32 %v1619_v41, %v1411_v14  ;;  %v790_v19 = vsel %vm787_vm7, %v789_v18, %v785_v16  ;;  %vm840_vm7 = vmor %vm838_vm6, %vm839_vm5 }
 0x336   : > { %v875_v59 = vmul.f32 %v664_v48, %v605_v58  ;;  %v608_v37 = vpop.xlane.xlu1 %607  ;;  %v750_v48 = vmul.f32 %v1616_v49, %v1419_v55  ;;  %v746_v58 = vand.u32 2147483648, %v1407_v44 }
 0x337   : > { %900 = vst.msk [vmem:[%s1530_s10 + $0x40] sm:$0xff] %vm891_vm14, %v883_v7  ;;  %v876_v5 = vmul.f32 %v678_v1, %v608_v37  ;;  %v695_v54 = vsub.f32 1.0, %v694_v15  ;;  %v744_v7 = vand.u32 2147483647, %v1407_v44  ;;  %v743_v1 = vsel %vm742_vm10, %v1578_v38, %v739_v29 }
 0x338   : > { %892 = vst.msk [vmem:[%s1530_s10] sm:$0xff] %vm891_vm14, %v875_v59  ;;  %v751_v52 = vsub.f32 1.0, %v750_v48  ;;  %v747_v60 = vor.u32 1.1754944e-38, %v746_v58  ;;  %v758_v38 = vand.u32 2147483647, %v1419_v55  ;;  %v862_v55 = vmul.f32 %v1079_v4, %v1423_v53 }
 0x339   : > { %893 = vst.msk [vmem:[%s1530_s10 + $0x8] sm:$0xff] %vm891_vm14, %v876_v5  ;;  %v696_v37 = vmul.f32 %v1619_v41, %v695_v54  ;;  %vm745_vm11 = vcmp.eq.f32.partialorder %v744_v7, 8.507059e+37  ;;  %v835_v5 = vsub.f32 1.0, %v834_v21  ;;  %vm866_vm10 = vweird.f32 %v1423_v53 }
 0x33a   : > { %v752_v59 = vmul.f32 %v1616_v49, %v751_v52  ;;  %v748_v63 = vsel %vm745_vm11, %v747_v60, %v743_v1  ;;  %vm759_vm3 = vcmp.eq.f32.partialorder %v758_v38, 8.507059e+37  ;;  %vm868_vm11 = vmor %vm866_vm10, %vm867_vm9  ;;  %v806_v15 = vmul.f32 %v1081_v13, %v1425_v33 }
 0x33b   : > { %v697_v25 = vadd.f32 %v1619_v41, %v696_v37  ;;  %v836_v28 = vmul.f32 %v1644_v10, %v835_v5  ;;  %v856_v1 = vand.u32 2147483647, %v1413_v45 }
 0x33c   : > { %v620_v22 = vpop.xlane.xlu0 %619  ;;  %v753_v44 = vadd.f32 %v1616_v49, %v752_v59  ;;  %v807_v18 = vsub.f32 1.0, %v806_v15  ;;  %v858_v59 = vand.u32 2147483648, %v1413_v45 }
 0x33d   : > { %v641_v36 = vpop.xlane.xlu2 %640  ;;  %v880_v62 = vmul.f32 %v734_v34, %v620_v22  ;;  %vm857_vm5 = vcmp.eq.f32.partialorder %v856_v1, 8.507059e+37 }
 0x33e   : > { %v887_v57 = vmul.f32 %v832_v40, %v641_v36  ;;  %v635_v9 = vpop.xlane.xlu1 %634  ;;  %v757_v27 = vsel %vm756_vm0, %v1616_v49, %v753_v44  ;;  %v701_v40 = vsel %vm700_vm2, %v1619_v41, %v697_v25  ;;  %v837_v36 = vadd.f32 %v1644_v10, %v836_v28  ;;  %vm812_vm0 = vmor %vm810_vm15, %vm811_vm13 }
 0x33f   : > { %897 = vst.msk [vmem:[%s1530_s10 + $0x28] sm:$0xff] %vm891_vm14, %v880_v62  ;;  %v885_v43 = vmul.f32 %v804_v46, %v635_v9  ;;  %v762_v34 = vsel %vm759_vm3, %v761_v30, %v757_v27  ;;  %v706_v23 = vsel %vm703_vm4, %v705_v31, %v701_v40  ;;  %v863_v49 = vsub.f32 1.0, %v862_v55 }
 0x340   : > { %904 = vst.msk [vmem:[%s1530_s10 + $0x60] sm:$0xff] %vm891_vm14, %v887_v57  ;;  %v841_v57 = vsel %vm840_vm7, %v1644_v10, %v837_v36  ;;  %v845_v46 = vor.u32 1.1754944e-38, %v844_v39  ;;  %v808_v52 = vmul.f32 %v1081_v13, %v807_v18  ;;  %vm852_vm3 = vweird.f32 %v1413_v45 }
 0x341   : > { %902 = vst.msk [vmem:[%s1530_s10 + $0x50] sm:$0xff] %vm891_vm14, %v885_v43  ;;  %v864_v9 = vmul.f32 %v1079_v4, %v863_v49  ;;  %v859_v37 = vor.u32 1.1754944e-38, %v858_v59 }
 0x342   : > { %v846_v17 = vsel %vm843_vm8, %v845_v46, %v841_v57 }
 0x343   : > { %v865_v12 = vadd.f32 %v1079_v4, %v864_v9 }
 0x344   : > { %v611_v35 = vpop.xlane.xlu0 %610 }
 0x345   : > { %v632_v0 = vpop.xlane.xlu2 %631  ;;  %v877_v20 = vmul.f32 %v692_v51, %v611_v35  ;;  %v869_v48 = vsel %vm868_vm11, %v1079_v4, %v865_v12  ;;  %v1083_v51 = vpop.eup %1082 }
 0x346   : > { %v884_v8 = vmul.f32 %v790_v19, %v632_v0  ;;  %v874_v16 = vsel %vm871_vm12, %v873_v32, %v869_v48  ;;  %v848_v35 = vmul.f32 %v1083_v51, %v1413_v45  ;;  %v809_v19 = vadd.f32 %v1081_v13, %v808_v52 }
 0x347   : > { %894 = vst.msk [vmem:[%s1530_s10 + $0x10] sm:$0xff] %vm891_vm14, %v877_v20  ;;  %v816_v0 = vand.u32 2147483648, %v1425_v33  ;;  %v814_v20 = vand.u32 2147483647, %v1425_v33  ;;  %vm853_vm2 = vweird.f32 %v1083_v51 }
 0x348   : > { %901 = vst.msk [vmem:[%s1530_s10 + $0x48] sm:$0xff] %vm891_vm14, %v884_v8  ;;  %v849_v53 = vsub.f32 1.0, %v848_v35  ;;  %v813_v10 = vsel %vm812_vm0, %v1081_v13, %v809_v19  ;;  %vm854_vm4 = vmor %vm852_vm3, %vm853_vm2 }
 0x349   : > { %v817_v8 = vor.u32 1.1754944e-38, %v816_v0  ;;  %vm815_vm1 = vcmp.eq.f32.partialorder %v814_v20, 8.507059e+37 }
 0x34a   : > { %v850_v54 = vmul.f32 %v1083_v51, %v849_v53 }
 0x34b   : > { %v818_v29 = vsel %vm815_vm1, %v817_v8, %v813_v10 }
 0x34c   : > { %v851_v21 = vadd.f32 %v1083_v51, %v850_v54 }
 0x34d   : > { %v623_v2 = vpop.xlane.xlu2 %622 }
 0x34e   : > { %v881_v56 = vmul.f32 %v748_v63, %v623_v2  ;;  %v855_v33 = vsel %vm854_vm4, %v1083_v51, %v851_v21 }
 0x34f   : > { %v860_v60 = vsel %vm857_vm5, %v859_v37, %v855_v33 }
 0x350   : > { %898 = vst.msk [vmem:[%s1530_s10 + $0x30] sm:$0xff] %vm891_vm14, %v881_v56 }
 0x354   : > { %v626_v22 = vpop.xlane.xlu1 %625 }
 0x355   : > { %v882_v42 = vmul.f32 %v762_v34, %v626_v22  ;;  %v614_v14 = vpop.xlane.xlu2 %613 }
 0x356   : > { %v878_v62 = vmul.f32 %v706_v23, %v614_v14 }
 0x357   : > { %899 = vst.msk [vmem:[%s1530_s10 + $0x38] sm:$0xff] %vm891_vm14, %v882_v42 }
 0x358   : > { %895 = vst.msk [vmem:[%s1530_s10 + $0x18] sm:$0xff] %vm891_vm14, %v878_v62 }
 0x35c   : > { %v644_v41 = vpop.xlane.xlu1 %643 }
 0x35d   : > { %v888_v43 = vmul.f32 %v846_v17, %v644_v41 }
 0x35f   : > { %905 = vst.msk [vmem:[%s1530_s10 + $0x68] sm:$0xff] %vm891_vm14, %v888_v43 }
 0x366   : > { %v650_v50 = vpop.xlane.xlu2 %649 }
 0x367   : > { %v890_v11 = vmul.f32 %v874_v16, %v650_v50 }
 0x369   : > { %907 = vst.msk [vmem:[%s1530_s10 + $0x78] sm:$0xff] %vm891_vm14, %v890_v11 }
 0x378   : > { %v638_v58 = vpop.xlane.xlu0 %637 }
 0x379   : > { %v886_v7 = vmul.f32 %v818_v29, %v638_v58 }
 0x37b   : > { %903 = vst.msk [vmem:[%s1530_s10 + $0x58] sm:$0xff] %vm891_vm14, %v886_v7 }
 0x380   : > { %v647_v5 = vpop.xlane.xlu0 %646 }
 0x381   : > { %v889_v63 = vmul.f32 %v860_v60, %v647_v5 }
 0x383   : > { %906 = vst.msk [vmem:[%s1530_s10 + $0x70] sm:$0xff] %vm891_vm14, %v889_v63 }
 0x384 PF: > { %s13_s12 = sadd.s32 1, %s1090_s12  }
 0x385   : > { %p10_p4 = scmp.ge.s32.totalorder %s13_s12, 4  }
 0x387   :  { %12 = sbr.rel (!%p10_p4) target bundleno = 1 (0x1), region = 62 }

</bundles_post_ra>
